<compile_context>
chip_gen: v5e
topology: v5e:2x2
jax: 0.10.0
libtpu: 0.0.40
codegen_flags: <defaults>
</compile_context>

<pallas_src>
import math

import jax
import jax.numpy as jnp
from jax import lax
from jax.experimental import pallas as pl
from jax.experimental.pallas import tpu as pltpu


# Rows per inner chunk inside the kernel. Each chunk lane-broadcasts three
# (sub, 1) tap columns (~3*sub/8 live vregs); sub=128 keeps that at ~48 of the
# 64 vregs, so large per-grid-step blocks stay mem-bound instead of spill-bound.
_SUB_ROWS = 128


# ----------------------------- Pallas kernel -----------------------------

def _token_embed_kernel(xm1_ref, x0_ref, xp1_ref, w_ref, b_ref, o_ref):
    """Circular Conv1d(1 -> d_model, k=3) on one (rows, feature) tile.

    xm1/x0/xp1_ref: (tR, 1)  taps x[(s-1)%S], x[s], x[(s+1)%S] per flattened row
    w_ref:          (3, tD)  conv taps for this feature tile
    b_ref:          (1, tD)  conv bias tile
    o_ref:          (tR, tD) output tile (lane-dense when tD % 128 == 0)
    """
    tR = o_ref.shape[0]
    w0 = w_ref[0:1, :]
    w1 = w_ref[1:2, :]
    w2 = w_ref[2:3, :]
    b = b_ref[...]

    sub = min(_SUB_ROWS, tR)
    n_sub = tR // sub            # wrapper guarantees tR % sub == 0

    def chunk(r0):
        rs = pl.ds(r0, sub)
        # (sub,1) x (1,tD) VPU broadcast-FMAs -> (sub,tD); exact f32.
        o_ref[rs, :] = (xm1_ref[rs, :] * w0
                        + x0_ref[rs, :] * w1
                        + xp1_ref[rs, :] * w2
                        + b).astype(o_ref.dtype)

    if n_sub == 1:
        chunk(0)
    else:
        def body(i, carry):
            chunk(pl.multiple_of(i * sub, sub))
            return carry
        # Real loop (not Python-unrolled) so live ranges are bounded per chunk;
        # the kernel is HBM-write bound, so loop overhead is hidden anyway.
        lax.fori_loop(0, n_sub, body, 0)


# ----------------------------- tiling helpers -----------------------------

def _pick_feature_tile(D):
    """Largest multiple of 128 that divides D (capped at 512); else full D."""
    if D % 128 == 0:
        for cand in (512, 384, 256, 128):
            if cand <= D and D % cand == 0:
                return cand
        return 128
    return D  # small / odd d_model: single full-width block (== array dim)


def _pick_row_tile(R, tD, itemsize, target_bytes=2 * 1024 * 1024):
    """Row block sized so each output tile is ~2 MiB (~4 MiB double-buffered,
    comfortably inside v5e's 16 MiB / v7x's 32 MiB default scoped VMEM) and a
    multiple of the in-kernel chunk size so the chunk loop covers the block."""
    if R <= _SUB_ROWS:
        return R
    max_rows = max(_SUB_ROWS, target_bytes // (tD * itemsize))
    tR = min(R, max_rows)
    return max(_SUB_ROWS, (tR // _SUB_ROWS) * _SUB_ROWS)


# ----------------------------- wrapper -----------------------------

def token_embedding(x, conv_w, conv_b):
    """TokenEmbedding forward.

    x:      (B, S, 1)  float32 scalar series
    conv_w: (3, D)     conv taps, conv_w[k, d] == torch weight[d, 0, k]
    conv_b: (D,)       conv bias
    returns (B, S, D)  float32
    """
    B, S, c_in = x.shape
    assert c_in == 1
    D = conv_w.shape[1]
    tD = _pick_feature_tile(D)
    n_feat = D // tD

    # Flatten (B, S) -> rows and build the 3 circular taps in the wrapper.
    # These are O(B*S) bytes -- negligible next to the (B*S, D) output -- and
    # make every (row, feature) tile self-contained.
    xs = x[:, :, 0]                                   # (B, S)
    R = B * S
    xm1 = jnp.roll(xs, 1, axis=1).reshape(R, 1)       # x[(s-1) mod S]
    x0 = xs.reshape(R, 1)                             # x[s]
    xp1 = jnp.roll(xs, -1, axis=1).reshape(R, 1)      # x[(s+1) mod S]

    tR = _pick_row_tile(R, tD, jnp.dtype(x.dtype).itemsize)
    n_rows = pl.cdiv(R, tR)

    out_flat = pl.pallas_call(
        _token_embed_kernel,
        out_shape=jax.ShapeDtypeStruct((R, D), x.dtype),
        # Feature tiles OUTER, rows INNER: the (3, tD)/(1, tD) weight & bias
        # blocks keep a constant block index across the inner row sweep, so
        # they stay resident in VMEM instead of being re-DMA'd every step.
        grid=(n_feat, n_rows),
        in_specs=[
            pl.BlockSpec((tR, 1), lambda d, r: (r, 0)),
            pl.BlockSpec((tR, 1), lambda d, r: (r, 0)),
            pl.BlockSpec((tR, 1), lambda d, r: (r, 0)),
            pl.BlockSpec((3, tD), lambda d, r: (0, d)),
            pl.BlockSpec((1, tD), lambda d, r: (0, d)),
        ],
        out_specs=pl.BlockSpec((tR, tD), lambda d, r: (r, d)),
        compiler_params=pltpu.CompilerParams(
            dimension_semantics=("parallel", "parallel")),
    )(xm1, x0, xp1, conv_w, conv_b.reshape(1, D))

    return out_flat.reshape(B, S, D)


# ----------------------------- main -----------------------------

if __name__ == "__main__":
    B, S, d_model = 2, 8, 128   # d_model chosen lane-dense (multiple of 128)

    key = jax.random.PRNGKey(0)
    k_x, k_w, k_b = jax.random.split(key, 3)

    # kaiming_normal_(mode='fan_in', nonlinearity='leaky_relu'):
    #   fan_in = in_channels * kernel_size = 3, gain = sqrt(2) -> std = sqrt(2/3)
    conv_w = math.sqrt(2.0 / 3.0) * jax.random.normal(
        k_w, (3, d_model), jnp.float32)
    # PyTorch Conv1d default bias init: U(-1/sqrt(fan_in), 1/sqrt(fan_in))
    bound = 1.0 / math.sqrt(3.0)
    conv_b = jax.random.uniform(k_b, (d_model,), jnp.float32, -bound, bound)

    x = jax.random.normal(k_x, (B, S, 1), jnp.float32)

    fwd = jax.jit(token_embedding)
    out = jax.block_until_ready(fwd(x, conv_w, conv_b))

    # Pure-JAX reference: circular 3-tap FIR == Conv1d(1->D, k=3, circular pad).
    xs_ref = x[:, :, 0]
    ref = (jnp.roll(xs_ref, 1, axis=1)[..., None] * conv_w[0]
           + xs_ref[..., None] * conv_w[1]
           + jnp.roll(xs_ref, -1, axis=1)[..., None] * conv_w[2]
           + conv_b)

    assert out.shape == (B, S, d_model), out.shape
    assert bool(jnp.all(jnp.isfinite(out)))
    assert bool(jnp.allclose(out, ref, atol=1e-5, rtol=1e-5))
    print("KERNEL_OK")
</pallas_src>

<mosaic_0001>
module attributes {stable_mosaic.version = 11 : i64} {
  func.func @_token_embed_kernel(%arg0: i32, %arg1: i32, %arg2: memref<16x1xf32, #tpu.memory_space<vmem>>, %arg3: memref<16x1xf32, #tpu.memory_space<vmem>>, %arg4: memref<16x1xf32, #tpu.memory_space<vmem>>, %arg5: memref<3x128xf32, #tpu.memory_space<vmem>>, %arg6: memref<1x128xf32, #tpu.memory_space<vmem>>, %arg7: memref<16x128xf32, #tpu.memory_space<vmem>>) attributes {dimension_semantics = [#tpu.dimension_semantics<parallel>, #tpu.dimension_semantics<parallel>], iteration_bounds = array<i64: 1, 1>, scalar_prefetch = 0 : i64, scratch_operands = 0 : i64, tpu.core_type = #tpu.core_type<tc>, window_params = [{transform_indices = @transform_0, window_bounds = array<i64: 16, 1>}, {transform_indices = @transform_1, window_bounds = array<i64: 16, 1>}, {transform_indices = @transform_2, window_bounds = array<i64: 16, 1>}, {transform_indices = @transform_3, window_bounds = array<i64: 3, 128>}, {transform_indices = @transform_4, window_bounds = array<i64: 1, 128>}, {transform_indices = @transform_5, window_bounds = array<i64: 16, 128>}]} {
    %c0 = arith.constant 0 : index
    %c0_0 = arith.constant 0 : index
    %0 = vector.load %arg5[%c0, %c0_0] : memref<3x128xf32, #tpu.memory_space<vmem>>, vector<1x128xf32>
    %c1 = arith.constant 1 : index
    %c0_1 = arith.constant 0 : index
    %1 = vector.load %arg5[%c1, %c0_1] : memref<3x128xf32, #tpu.memory_space<vmem>>, vector<1x128xf32>
    %c2 = arith.constant 2 : index
    %c0_2 = arith.constant 0 : index
    %2 = vector.load %arg5[%c2, %c0_2] : memref<3x128xf32, #tpu.memory_space<vmem>>, vector<1x128xf32>
    %c0_3 = arith.constant 0 : index
    %c0_4 = arith.constant 0 : index
    %3 = vector.load %arg6[%c0_3, %c0_4] : memref<1x128xf32, #tpu.memory_space<vmem>>, vector<1x128xf32>
    %c0_5 = arith.constant 0 : index
    %c0_6 = arith.constant 0 : index
    %4 = vector.load %arg2[%c0_5, %c0_6] : memref<16x1xf32, #tpu.memory_space<vmem>>, vector<16x1xf32>
    %5 = vector.broadcast %4 : vector<16x1xf32> to vector<16x128xf32>
    %6 = vector.broadcast %0 : vector<1x128xf32> to vector<16x128xf32>
    %7 = arith.mulf %5, %6 : vector<16x128xf32>
    %c0_7 = arith.constant 0 : index
    %c0_8 = arith.constant 0 : index
    %8 = vector.load %arg3[%c0_7, %c0_8] : memref<16x1xf32, #tpu.memory_space<vmem>>, vector<16x1xf32>
    %9 = vector.broadcast %8 : vector<16x1xf32> to vector<16x128xf32>
    %10 = vector.broadcast %1 : vector<1x128xf32> to vector<16x128xf32>
    %11 = arith.mulf %9, %10 : vector<16x128xf32>
    %12 = arith.addf %7, %11 : vector<16x128xf32>
    %c0_9 = arith.constant 0 : index
    %c0_10 = arith.constant 0 : index
    %13 = vector.load %arg4[%c0_9, %c0_10] : memref<16x1xf32, #tpu.memory_space<vmem>>, vector<16x1xf32>
    %14 = vector.broadcast %13 : vector<16x1xf32> to vector<16x128xf32>
    %15 = vector.broadcast %2 : vector<1x128xf32> to vector<16x128xf32>
    %16 = arith.mulf %14, %15 : vector<16x128xf32>
    %17 = arith.addf %12, %16 : vector<16x128xf32>
    %18 = vector.broadcast %3 : vector<1x128xf32> to vector<16x128xf32>
    %19 = arith.addf %17, %18 : vector<16x128xf32>
    %c0_11 = arith.constant 0 : index
    %c0_12 = arith.constant 0 : index
    %20 = vector.load %arg7[%c0_11, %c0_12] : memref<16x128xf32, #tpu.memory_space<vmem>>, vector<16x128xf32>
    tpu.vector_store %arg7[%c0_11, %c0_12], %19 {strides = array<i32>} : memref<16x128xf32, #tpu.memory_space<vmem>>, vector<16x128xf32>,
    return
  }
  func.func @transform_0(%arg0: i32, %arg1: i32) -> (i32, i32) {
    %c0_i32 = arith.constant 0 : i32
    %c0_i32_0 = arith.constant 0 : i32
    return %arg1, %c0_i32 : i32, i32
  }
  func.func @transform_1(%arg0: i32, %arg1: i32) -> (i32, i32) {
    %c0_i32 = arith.constant 0 : i32
    %c0_i32_0 = arith.constant 0 : i32
    return %arg1, %c0_i32 : i32, i32
  }
  func.func @transform_2(%arg0: i32, %arg1: i32) -> (i32, i32) {
    %c0_i32 = arith.constant 0 : i32
    %c0_i32_0 = arith.constant 0 : i32
    return %arg1, %c0_i32 : i32, i32
  }
  func.func @transform_3(%arg0: i32, %arg1: i32) -> (i32, i32) {
    %c0_i32 = arith.constant 0 : i32
    %c0_i32_0 = arith.constant 0 : i32
    return %c0_i32, %arg0 : i32, i32
  }
  func.func @transform_4(%arg0: i32, %arg1: i32) -> (i32, i32) {
    %c0_i32 = arith.constant 0 : i32
    %c0_i32_0 = arith.constant 0 : i32
    return %c0_i32, %arg0 : i32, i32
  }
  func.func @transform_5(%arg0: i32, %arg1: i32) -> (i32, i32) {
    %c0_i32 = arith.constant 0 : i32
    return %arg1, %arg0 : i32, i32
  }
}

</mosaic_0001>

<bundles_post_ra>
// kernel: token_embedding.1
= control target key start
LH: loop header
LB: loop body
LE: loop exit
PB: predicated region body
PF: predicated region fallthrough
CT: control target
= control target key end

     0   :  { %v136_v2 = vmov 0   ;;  %s203_s0 = inlined_call_operand.vmem [shape: f32[16,1], index: 0, kind: input, shape index: {}]   ;;  %s204_s1 = inlined_call_operand.vmem [shape: f32[16,1], index: 1, kind: input, shape index: {}]   ;;  %s205_s2 = inlined_call_operand.vmem [shape: f32[16,1], index: 2, kind: input, shape index: {}]   ;;  %s206_s3 = inlined_call_operand.vmem [shape: f32[3,128], index: 3, kind: input, shape index: {}]   ;;  %s207_s4 = inlined_call_operand.vmem [shape: f32[1,128], index: 4, kind: input, shape index: {}]   ;;  %s208_s5 = inlined_call_operand.hbm [shape: f32[16,128], index: 5, kind: output, shape index: {}]  }
   0x1   :  { %v40_v0 = vld [vmem:[%s204_s1] sm:$0xff]  ;;  %104 = vset.pattern.permute.xlu1 %v136_v2  ;;  %103 = vset.pattern.permute.xlu0 %v136_v2 }
   0x2   :  { %v25_v1 = vld [vmem:[%s203_s0] sm:$0xff]  ;;  %44 = vperm.xlu1 %104, %v40_v0   ;;  %105 = vset.pattern.permute.xlu2 %v136_v2 }
   0x3   :  { %v57_v3 = vld [vmem:[%s205_s2] sm:$0xff]  ;;  %29 = vperm.xlu0 %103, %v25_v1  }
   0x4   :  { %10 = vsyncpa [#allocation3], 0  ;;  %61 = vperm.xlu2 %105, %v57_v3   ;;  %v41_v4 = vld [vmem:[%s204_s1 + $0x8] sm:$0xff]  ;;  %v106_v8 = vld [vmem:[%s206_s3 + $0x2] ss:$0 sm:$0xff]  ;;  %s87_s13 = sshll.u32 %s208_s5, 4  ;;  %s88_s13 = int_to_ptr.hbm [resolvable:$true] %s87_s13 }
   0x5   :  { %v26_v5 = vld [vmem:[%s203_s0 + $0x8] sm:$0xff]  ;;  %v107_v9 = vld [vmem:[%s206_s3 + $0x1] ss:$0 sm:$0xff]  ;;  %v108_v10 = vld [vmem:[%s206_s3] ss:$0 sm:$0xff]  ;;  %s137_s3 = smov [#allocation2]  }
   0x6   :  { %v58_v6 = vld [vmem:[%s205_s2 + $0x8] sm:$0xff]  ;;  %v109_v17 = vld [vmem:[%s207_s4] ss:$0 sm:$0xff]  ;;  %s85_s10 = sshll.u32 %s137_s3, 4  ;;  %s138_s4 = smov 128   ;;  %s86_s10 = int_to_ptr.vmem [resolvable:$true] %s85_s10 }
   0x7   :  { %s139_s14 = smov 8  }
   0xa   :  { %49 = vperm.xlu1 %104, %v41_v4  }
   0xb   :  { %34 = vperm.xlu0 %103, %v26_v5  }
   0xc   :  { %66 = vperm.xlu2 %105, %v58_v6  }
  0x5e   :  { %v62_v7 = vpop.permute.xlu2 %61 }
  0x5f   :  { %v70_v13 = vmul.f32 %v106_v8, %v62_v7 }
  0x66   :  { %v67_v20 = vpop.permute.xlu2 %66 }
  0x67   :  { %v71_v25 = vmul.f32 %v106_v8, %v67_v20 }
  0x74   :  { %v45_v11 = vpop.permute.xlu1 %44 }
  0x75   :  { %v30_v12 = vpop.permute.xlu0 %29  ;;  %v53_v14 = vmul.f32 %v107_v9, %v45_v11 }
  0x76   :  { %v38_v15 = vmul.f32 %v108_v10, %v30_v12 }
  0x78   :  { %v55_v16 = vadd.f32 %v53_v14, %v38_v15 }
  0x7a   :  { %v72_v18 = vadd.f32 %v70_v13, %v55_v16 }
  0x7c   :  { %v77_v19 = vadd.f32 %v109_v17, %v72_v18  ;;  %v50_v21 = vpop.permute.xlu1 %49 }
  0x7d   :  { %v35_v22 = vpop.permute.xlu0 %34  ;;  %v54_v23 = vmul.f32 %v107_v9, %v50_v21 }
  0x7e   :  { %79 = vst [vmem:[#allocation2] sm:$0xff] %v77_v19  ;;  %v39_v24 = vmul.f32 %v108_v10, %v35_v22 }
  0x80   :  { %v56_v26 = vadd.f32 %v54_v23, %v39_v24 }
  0x82   :  { %v73_v27 = vadd.f32 %v71_v25, %v56_v26 }
  0x84   :  { %v78_v28 = vadd.f32 %v109_v17, %v73_v27 }
  0x86   :  { %80 = vst [vmem:[#allocation2 + $0x8] sm:$0xff] %v78_v28 }
  0x87   :  { %93 = dma.vmem_to_hbm [thread:$0]  %s86_s10, 256, %s88_s13, [#allocation3], %s138_s4, %s138_s4, %s139_s14  }
  0x88   :  { %134 = dma.done.wait [#allocation3], 256  }
  0x89   :  { %135 = vsyncadd [#allocation3], 4294967040 }
  0x8a   :  { %98 = vsyncpa [#allocation3], 1 }

</bundles_post_ra>
